<compile_context>
chip_gen: v6e
topology: v6e:2x2x1
jax: 0.10.0
libtpu: 0.0.40
codegen_flags: <defaults>
</compile_context>

<pallas_src>
import functools
from typing import NamedTuple

import jax
import jax.numpy as jnp
from jax.experimental import pallas as pl
from jax.experimental.pallas import tpu as pltpu


def _round_up(x, m):
    return ((x + m - 1) // m) * m


def _classifier_kernel(x_ref, w1_ref, b1_ref, w2_ref, b2_ref, o_ref):
    # linear1: (TB, F) @ (F, Hp) — bf16 MXU inputs, f32 accumulation.
    h = jnp.dot(
        x_ref[...].astype(jnp.bfloat16),
        w1_ref[...],
        preferred_element_type=jnp.float32,
    )
    # bias-add + tanh in f32 (VPU / EUP); padded hidden lanes: tanh(0 + 0) = 0.
    h = jnp.tanh(h + b1_ref[...])

    # linear2: (TB, Hp) @ (Hp, Lp) — padded hidden rows of w2 are zero.
    logits = jnp.dot(
        h.astype(jnp.bfloat16),
        w2_ref[...],
        preferred_element_type=jnp.float32,
    )
    # Padded label lanes get -inf from the (pre-masked) bias, so they
    # contribute exactly 0 to the log-sum-exp.  No iota/where needed.
    logits = logits + b2_ref[...]

    m = jnp.max(logits, axis=-1, keepdims=True)
    shifted = logits - m
    lse = jnp.log(jnp.sum(jnp.exp(shifted), axis=-1, keepdims=True))
    o_ref[...] = (shifted - lse).astype(o_ref.dtype)


class PreparedParams(NamedTuple):
    w1: jax.Array   # (F, H_pad) bf16, padded hidden columns zero
    b1: jax.Array   # (1, H_pad) f32, padded entries zero
    w2: jax.Array   # (H_pad, L_pad) bf16, padded rows/cols zero
    b2: jax.Array   # (1, L_pad) f32, padded label lanes -inf
    num_labels: int


def prepare_classifier_params(w1, b1, w2, b2) -> PreparedParams:
    """One-time padding + bf16 cast of the weights (hoisted out of forward)."""
    F_in, H = w1.shape
    L = w2.shape[1]
    H_pad = _round_up(H, 128)
    L_pad = _round_up(L, 128)

    w1_p = jnp.pad(w1, ((0, 0), (0, H_pad - H))).astype(jnp.bfloat16)
    b1_p = jnp.pad(b1.astype(jnp.float32), (0, H_pad - H)).reshape(1, H_pad)
    w2_p = jnp.pad(w2, ((0, H_pad - H), (0, L_pad - L))).astype(jnp.bfloat16)
    # Bake the label mask into the bias: padded lanes -> -inf (kept in f32).
    b2_p = jnp.pad(
        b2.astype(jnp.float32), (0, L_pad - L), constant_values=-jnp.inf
    ).reshape(1, L_pad)
    return PreparedParams(w1=w1_p, b1=b1_p, w2=w2_p, b2=b2_p, num_labels=L)


@functools.partial(jax.jit, static_argnames=("num_labels",))
def _forward_impl(x, w1_p, b1_p, w2_p, b2_p, *, num_labels):
    B, F_in = x.shape
    H_pad = w1_p.shape[1]
    L_pad = w2_p.shape[1]

    # Batch tiling: multiple of 8 sublanes, capped at 2048 rows per step
    # (step-overhead amortization), but keep >= 2 grid steps when the batch
    # allows it so the "parallel" axis can feed both v7x TensorCores.
    B8 = _round_up(B, 8)
    TB = min(2048, B8)
    if B8 >= 16:
        TB = min(TB, _round_up((B8 + 1) // 2, 8))
    B_pad = _round_up(B8, TB)

    x_p = jnp.pad(x, ((0, B_pad - B), (0, 0)))

    out_padded = pl.pallas_call(
        _classifier_kernel,
        out_shape=jax.ShapeDtypeStruct((B_pad, L_pad), jnp.float32),
        grid_spec=pl.GridSpec(
            grid=(B_pad // TB,),
            in_specs=[
                pl.BlockSpec((TB, F_in), lambda i: (i, 0)),       # x tile per step
                pl.BlockSpec((F_in, H_pad), lambda i: (0, 0)),    # w1 resident
                pl.BlockSpec((1, H_pad), lambda i: (0, 0)),       # b1 resident
                pl.BlockSpec((H_pad, L_pad), lambda i: (0, 0)),   # w2 resident
                pl.BlockSpec((1, L_pad), lambda i: (0, 0)),       # b2 resident
            ],
            out_specs=pl.BlockSpec((TB, L_pad), lambda i: (i, 0)),
        ),
        compiler_params=pltpu.CompilerParams(
            dimension_semantics=("parallel",),  # shards batch tiles across v7x TCs
        ),
    )(x_p, w1_p, b1_p, w2_p, b2_p)

    # Slice away batch and label padding.
    return out_padded[:B, :num_labels]


def text_classifier_forward(x, params: PreparedParams):
    """x: (B, F) f32; params from prepare_classifier_params()."""
    return _forward_impl(
        x, params.w1, params.b1, params.w2, params.b2,
        num_labels=params.num_labels,
    )


def reference_forward(x, w1, b1, w2, b2):
    h = jnp.tanh(x @ w1 + b1)
    logits = h @ w2 + b2
    return jax.nn.log_softmax(logits, axis=1)


if __name__ == "__main__":
    # Small shapes consistent with the module: batch=8, num_features=32,
    # hidden=600 (fixed by the module), num_labels=10.
    B, NUM_FEATURES, HIDDEN, NUM_LABELS = 8, 32, 600, 10

    key = jax.random.PRNGKey(0)
    kx, kw1, kb1, kw2, kb2 = jax.random.split(key, 5)

    x = jax.random.normal(kx, (B, NUM_FEATURES), dtype=jnp.float32)
    lim1 = 1.0 / (NUM_FEATURES ** 0.5)
    lim2 = 1.0 / (HIDDEN ** 0.5)
    w1 = jax.random.uniform(kw1, (NUM_FEATURES, HIDDEN), jnp.float32, -lim1, lim1)
    b1 = jax.random.uniform(kb1, (HIDDEN,), jnp.float32, -lim1, lim1)
    w2 = jax.random.uniform(kw2, (HIDDEN, NUM_LABELS), jnp.float32, -lim2, lim2)
    b2 = jax.random.uniform(kb2, (NUM_LABELS,), jnp.float32, -lim2, lim2)

    # One-time parameter preparation (pad + bf16 cast), reused across calls.
    params = prepare_classifier_params(w1, b1, w2, b2)

    out = text_classifier_forward(x, params)
    out = jax.block_until_ready(out)

    ref = reference_forward(x, w1, b1, w2, b2)
    assert out.shape == (B, NUM_LABELS)
    # bf16 MXU inputs (f32 accumulation) vs. full-f32 reference -> loose tol.
    assert jnp.allclose(out, ref, atol=2e-2, rtol=2e-2), (
        float(jnp.max(jnp.abs(out - ref)))
    )
    # log-probs must normalize: logsumexp over labels ~ 0.
    assert jnp.allclose(jax.scipy.special.logsumexp(out, axis=1), 0.0, atol=1e-3)

    print("KERNEL_OK")
</pallas_src>

<mosaic_0001>
module attributes {stable_mosaic.version = 11 : i64} {
  func.func @_classifier_kernel(%arg0: i32, %arg1: memref<8x32xf32, #tpu.memory_space<vmem>>, %arg2: memref<32x640xbf16, #tpu.memory_space<vmem>>, %arg3: memref<1x640xf32, #tpu.memory_space<vmem>>, %arg4: memref<640x128xbf16, #tpu.memory_space<vmem>>, %arg5: memref<1x128xf32, #tpu.memory_space<vmem>>, %arg6: memref<8x128xf32, #tpu.memory_space<vmem>>) attributes {dimension_semantics = [#tpu.dimension_semantics<parallel>], iteration_bounds = array<i64: 1>, scalar_prefetch = 0 : i64, scratch_operands = 0 : i64, tpu.core_type = #tpu.core_type<tc>, window_params = [{transform_indices = @transform_0, window_bounds = array<i64: 8, 32>}, {pipeline_mode = #tpu.pipeline_mode<synchronous>, transform_indices = @transform_1, window_bounds = array<i64: 32, 640>}, {pipeline_mode = #tpu.pipeline_mode<synchronous>, transform_indices = @transform_2, window_bounds = array<i64: 1, 640>}, {pipeline_mode = #tpu.pipeline_mode<synchronous>, transform_indices = @transform_3, window_bounds = array<i64: 640, 128>}, {pipeline_mode = #tpu.pipeline_mode<synchronous>, transform_indices = @transform_4, window_bounds = array<i64: 1, 128>}, {transform_indices = @transform_5, window_bounds = array<i64: 8, 128>}]} {
    %c0 = arith.constant 0 : index
    %c0_0 = arith.constant 0 : index
    %0 = vector.load %arg1[%c0, %c0_0] : memref<8x32xf32, #tpu.memory_space<vmem>>, vector<8x32xf32>
    %1 = arith.truncf %0 : vector<8x32xf32> to vector<8x32xbf16>
    %c0_1 = arith.constant 0 : index
    %c0_2 = arith.constant 0 : index
    %2 = vector.load %arg2[%c0_1, %c0_2] : memref<32x640xbf16, #tpu.memory_space<vmem>>, vector<32x640xbf16>
    %cst = arith.constant dense<0.000000e+00> : vector<8x640xf32>
    %3 = tpu.matmul %1, %2, %cst {dimension_numbers = #tpu.dot_dimension_numbers<[1], [0], [0], [1], [0, 0, 1, 1], [], []>} : vector<8x32xbf16>, vector<32x640xbf16>, vector<8x640xf32> -> vector<8x640xf32>
    %c0_3 = arith.constant 0 : index
    %c0_4 = arith.constant 0 : index
    %4 = vector.load %arg3[%c0_3, %c0_4] : memref<1x640xf32, #tpu.memory_space<vmem>>, vector<1x640xf32>
    %5 = vector.broadcast %4 : vector<1x640xf32> to vector<8x640xf32>
    %6 = arith.addf %3, %5 : vector<8x640xf32>
    %7 = math.tanh %6 : vector<8x640xf32>
    %8 = arith.truncf %7 : vector<8x640xf32> to vector<8x640xbf16>
    %c0_5 = arith.constant 0 : index
    %c0_6 = arith.constant 0 : index
    %9 = vector.load %arg4[%c0_5, %c0_6] : memref<640x128xbf16, #tpu.memory_space<vmem>>, vector<640x128xbf16>
    %cst_7 = arith.constant dense<0.000000e+00> : vector<8x128xf32>
    %10 = tpu.matmul %8, %9, %cst_7 {dimension_numbers = #tpu.dot_dimension_numbers<[1], [0], [0], [1], [0, 0, 1, 1], [], []>} : vector<8x640xbf16>, vector<640x128xbf16>, vector<8x128xf32> -> vector<8x128xf32>
    %c0_8 = arith.constant 0 : index
    %c0_9 = arith.constant 0 : index
    %11 = vector.load %arg5[%c0_8, %c0_9] : memref<1x128xf32, #tpu.memory_space<vmem>>, vector<1x128xf32>
    %12 = vector.broadcast %11 : vector<1x128xf32> to vector<8x128xf32>
    %13 = arith.addf %10, %12 : vector<8x128xf32>
    %cst_10 = arith.constant dense<0xFF800000> : vector<8xf32>
    %14 = vector.multi_reduction <maximumf>, %13, %cst_10 [1] : vector<8x128xf32> to vector<8xf32>
    %15 = vector.shape_cast %14 : vector<8xf32> to vector<8x1xf32>
    %16 = vector.broadcast %15 : vector<8x1xf32> to vector<8x128xf32>
    %17 = arith.subf %13, %16 : vector<8x128xf32>
    %18 = math.exp %17 : vector<8x128xf32>
    %cst_11 = arith.constant dense<0.000000e+00> : vector<8xf32>
    %19 = vector.multi_reduction <add>, %18, %cst_11 [1] : vector<8x128xf32> to vector<8xf32>
    %20 = vector.shape_cast %19 : vector<8xf32> to vector<8x1xf32>
    %21 = math.log %20 : vector<8x1xf32>
    %22 = vector.broadcast %21 : vector<8x1xf32> to vector<8x128xf32>
    %23 = arith.subf %17, %22 : vector<8x128xf32>
    %c0_12 = arith.constant 0 : index
    %c0_13 = arith.constant 0 : index
    %24 = vector.load %arg6[%c0_12, %c0_13] : memref<8x128xf32, #tpu.memory_space<vmem>>, vector<8x128xf32>
    tpu.vector_store %arg6[%c0_12, %c0_13], %23 {strides = array<i32>} : memref<8x128xf32, #tpu.memory_space<vmem>>, vector<8x128xf32>,
    return
  }
  func.func @transform_0(%arg0: i32) -> (i32, i32) {
    %c0_i32 = arith.constant 0 : i32
    %c0_i32_0 = arith.constant 0 : i32
    return %arg0, %c0_i32 : i32, i32
  }
  func.func @transform_1(%arg0: i32) -> (i32, i32) {
    %c0_i32 = arith.constant 0 : i32
    %c0_i32_0 = arith.constant 0 : i32
    %c0_i32_1 = arith.constant 0 : i32
    return %c0_i32, %c0_i32_0 : i32, i32
  }
  func.func @transform_2(%arg0: i32) -> (i32, i32) {
    %c0_i32 = arith.constant 0 : i32
    %c0_i32_0 = arith.constant 0 : i32
    %c0_i32_1 = arith.constant 0 : i32
    return %c0_i32, %c0_i32_0 : i32, i32
  }
  func.func @transform_3(%arg0: i32) -> (i32, i32) {
    %c0_i32 = arith.constant 0 : i32
    %c0_i32_0 = arith.constant 0 : i32
    %c0_i32_1 = arith.constant 0 : i32
    return %c0_i32, %c0_i32_0 : i32, i32
  }
  func.func @transform_4(%arg0: i32) -> (i32, i32) {
    %c0_i32 = arith.constant 0 : i32
    %c0_i32_0 = arith.constant 0 : i32
    %c0_i32_1 = arith.constant 0 : i32
    return %c0_i32, %c0_i32_0 : i32, i32
  }
  func.func @transform_5(%arg0: i32) -> (i32, i32) {
    %c0_i32 = arith.constant 0 : i32
    %c0_i32_0 = arith.constant 0 : i32
    return %arg0, %c0_i32 : i32, i32
  }
}

</mosaic_0001>

<bundles_post_ra>
// kernel: _forward_impl.1
= control target key start
LH: loop header
LB: loop body
LE: loop exit
PB: predicated region body
PF: predicated region fallthrough
CT: control target
= control target key end

     0   :  { %10 = vsyncpa [#allocation3], 0  ;;  %s1180_s0 = inlined_call_operand.hbm [shape: f32[8,32], index: 0, kind: input, shape index: {}]   ;;  %s1181_s1 = inlined_call_operand.hbm [shape: bf16[32,640], index: 1, kind: input, shape index: {}]   ;;  %s1182_s2 = inlined_call_operand.hbm [shape: f32[1,640], index: 2, kind: input, shape index: {}]   ;;  %s1183_s3 = inlined_call_operand.hbm [shape: bf16[640,128], index: 3, kind: input, shape index: {}]   ;;  %s1184_s4 = inlined_call_operand.vmem [shape: f32[1,128], index: 4, kind: input, shape index: {}]   ;;  %s1185_s5 = inlined_call_operand.hbm [shape: f32[8,128], index: 5, kind: output, shape index: {}]  }
   0x1   :  { %11 = vsyncpa [#allocation6], 0 }
   0x2   :  { %12 = vsyncpa [#allocation9], 0 }
   0x3   :  { %13 = vsyncpa [#allocation4], 0  ;;  %s1103_s18 = smov [#allocation5]  }
   0x4   :  { %s29_s19 = sshll.u32 %s1103_s18, 4  ;;  %s30_s19 = int_to_ptr.vmem [resolvable:$true] %s29_s19 }
   0x5   :  { %s1003_s20 = scalar_lea.vmem %s30_s19, 1280  ;;  %p1008_p1 = scmp.lt.s32.totalorder %s30_s19, %s30_s19 }
   0x6   :  { %p1004_p0 = scmp.ne.s32.totalorder %s30_s19, %s1003_s20  ;;  %p1009_p2 = scmp.lt.s32.totalorder %s1003_s20, %s1003_s20 }
   0x8   :  { %p1010_p3 = por %p1009_p2, %p1008_p1 }
   0xa   :  { %p1011_p4 = pnand %p1010_p3, %p1004_p0 }
   0xc   :  { %1014 = shalt.err (!%p1011_p4)
}
   0xd   :  { %s1104_s21 = smov 320   ;;  %s1105_s22 = smov 20  }
   0xe   :  { %35 = dma.hbm_to_vmem [thread:$0]  %s1181_s1, 1280, %s30_s19, [#allocation6], %s1104_s21, %s1104_s21, %s1105_s22  }
   0xf   :  { %s1106_s25 = smov [#allocation2]   ;;  %s1107_s27 = smov [#allocation7]  }
  0x10   :  { %s20_s26 = sshll.u32 %s1106_s25, 4  ;;  %s42_s28 = sshll.u32 %s1107_s27, 4  ;;  %s21_s26 = int_to_ptr.vmem [resolvable:$true] %s20_s26  ;;  %s43_s28 = int_to_ptr.vmem [resolvable:$true] %s42_s28 }
  0x11   :  { %s1023_s29 = scalar_lea.vmem %s21_s26, 128  ;;  %p1028_p6 = scmp.lt.s32.totalorder %s21_s26, %s21_s26 }
  0x12   :  { %p1024_p5 = scmp.ne.s32.totalorder %s21_s26, %s1023_s29  ;;  %p1029_p7 = scmp.lt.s32.totalorder %s1023_s29, %s1023_s29 }
  0x14   :  { %p1030_p8 = por %p1029_p7, %p1028_p6 }
  0x16   :  { %p1031_p9 = pnand %p1030_p8, %p1024_p5 }
  0x18   :  { %1034 = shalt.err (!%p1031_p9)
}
  0x19   :  { %23 = dma.hbm_to_vmem [thread:$0]  %s1180_s0, 128, %s21_s26, [#allocation3]  }
  0x1a   :  { %s1043_s7 = scalar_lea.vmem %s43_s28, 80  ;;  %s1047_s1 = scalar_lea.vmem %s43_s28, 96 }
  0x1b   :  { %p1044_p10 = scmp.ne.s32.totalorder %s43_s28, %s1043_s7  ;;  %p1048_p11 = scmp.lt.s32.totalorder %s43_s28, %s43_s28 }
  0x1c   :  { %p1049_p12 = scmp.lt.s32.totalorder %s1047_s1, %s1043_s7 }
  0x1e   :  { %p1050_p13 = por %p1049_p12, %p1048_p11 }
  0x20   :  { %p1051_p0 = pnand %p1050_p13, %p1044_p10 }
  0x22   :  { %1054 = shalt.err (!%p1051_p0)
}
  0x23   :  { %45 = dma.hbm_to_vmem [thread:$0]  %s1182_s2, 80, %s43_s28, [#allocation6]  }
  0x24   :  { %s1108_s10 = smov [#allocation8]  }
  0x25   :  { %s51_s11 = sshll.u32 %s1108_s10, 4  ;;  %s52_s11 = int_to_ptr.vmem [resolvable:$true] %s51_s11 }
  0x26   :  { %s1063_s12 = scalar_lea.vmem %s52_s11, 5120  ;;  %p1068_p2 = scmp.lt.s32.totalorder %s52_s11, %s52_s11 }
  0x27   :  { %p1064_p1 = scmp.ne.s32.totalorder %s52_s11, %s1063_s12  ;;  %p1069_p3 = scmp.lt.s32.totalorder %s1063_s12, %s1063_s12 }
  0x29   :  { %p1070_p4 = por %p1069_p3, %p1068_p2 }
  0x2b   :  { %p1071_p5 = pnand %p1070_p4, %p1064_p1 }
  0x2d   :  { %1074 = shalt.err (!%p1071_p5)
}
  0x2e   :  { %s1109_s0 = smov 64   ;;  %s1110_s13 = smov 4  }
  0x2f   :  { %57 = dma.hbm_to_vmem [thread:$0]  %s1183_s3, 5120, %s52_s11, [#allocation9], %s1109_s0, %s1109_s0, %s1110_s13  }
  0x30   :  { %1095 = dma.done.wait [#allocation3], 128  }
  0x31   :  { %1096 = vsyncadd [#allocation3], 4294967168 }
  0x32   :  { %1097 = dma.done.wait [#allocation6], 1360  }
  0x33   :  { %1098 = vsyncadd [#allocation6], 4294965936 }
  0x34   :  { %1099 = dma.done.wait [#allocation9], 5120  }
  0x35   :  { %1100 = vsyncadd [#allocation9], 4294962176  ;;  %v1111_v0 = vmov 0   ;;  %v927_v1 = vld [vmem:[#allocation5 + $0x2c] ss:$20 sps:$4 sm:$0xff]   ;;  %v73_v5 = vld [vmem:[#allocation2] sm:$0xff]  ;;  %v89_v46 = vlaneseq }
  0x36   :  { %202 = vmatprep.mubr.bf16.mxu0 %v1111_v0  ;;  %v929_v2 = vld [vmem:[#allocation5 + $0x28] ss:$20 sps:$4 sm:$0xff]   ;;  %182 = vmatprep.subr.bf16.mxu0 %v927_v1  ;;  %v930_v3 = vld [vmem:[#allocation5 + $0x4] ss:$20 sps:$4 sm:$0xff]   ;;  %v932_v4 = vld [vmem:[#allocation5] ss:$20 sps:$4 sm:$0xff]   ;;  %v74_v7 = vpack.c.bf16 %v73_v5, %v73_v5 }
  0x37   :  { %183 = vmatpush1.bf16.msra.mxu0 %v929_v2  ;;  %v935_v6 = vld [vmem:[#allocation5 + $0x34] ss:$20 sps:$4 sm:$0xff]   ;;  %vm166_vm0 = vcmask 261120   ;;  %v933_v8 = vld [vmem:[#allocation5 + $0x30] ss:$20 sps:$4 sm:$0xff]   ;;  %v1112_v18 = vmov 0.0  }
  0x38   :  { %184 = vmatprep.subr.bf16.mxu0 %v930_v3  ;;  %v938_v9 = vld [vmem:[#allocation5 + $0xc] ss:$20 sps:$4 sm:$0xff]   ;;  %v936_v13 = vld [vmem:[#allocation5 + $0x8] ss:$20 sps:$4 sm:$0xff]   ;;  %v940_v19 = vld [vmem:[#allocation5 + $0x10] ss:$20 sps:$4 sm:$0xff]  }
  0x39   :  { %v941_v10 = vld [vmem:[#allocation8 + $0x78] sm:$0xff]   ;;  %v943_v12 = vld [vmem:[#allocation8 + $0x70] sm:$0xff]   ;;  %v945_v15 = vld [vmem:[#allocation8 + $0x68] sm:$0xff]   ;;  %vm1113_vm1 = vmmov 0   ;;  %v90_v47 = vshrl.u32 %v89_v46, 7  ;;  %s1114_s16 = smov [#allocation10]  }
  0x3a   :  { %v942_v11 = vld [vmem:[#allocation8 + $0x38] sm:$0xff]   ;;  %834 = vmatprep.subr.bf16.mxu1 %v941_v10  ;;  %v944_v14 = vld [vmem:[#allocation8 + $0x30] sm:$0xff]   ;;  %v946_v17 = vld [vmem:[#allocation8 + $0x28] sm:$0xff]  }
  0x3b   :  { %185 = vmatpush1.bf16.msra.mxu0 %v932_v4  ;;  %835 = vmatpush3.bf16.msra.mxu1 %v942_v11  ;;  %v939_v16 = vld [vmem:[#allocation5 + $0x38] ss:$20 sps:$4 sm:$0xff]   ;;  %v955_v28 = vld [vmem:[#allocation8 + $0xe8] sm:$0xff]   ;;  %v91_v48 = vsub.s32 0, %v90_v47  ;;  %v87_v49 = vld [vmem:[#allocation7] sm:$0x1f] }
  0x3c   :  { %223 = vmatprep.subr.bf16.mxu0 %v935_v6  ;;  %836 = vmatprep.subr.bf16.mxu1 %v943_v12  ;;  %v947_v20 = vld [vmem:[#allocation8 + $0xf8] sm:$0xff]   ;;  %v949_v22 = vld [vmem:[#allocation8 + $0x60] sm:$0xff]   ;;  %v951_v24 = vld [vmem:[#allocation8 + $0xf0] sm:$0xff]   ;;  %v95_v50 = vsub.s32 1, %v90_v47  ;;  %v99_v55 = vsub.s32 2, %v90_v47  ;;  %v103_v58 = vsub.s32 3, %v90_v47 }
  0x3d   :  { %v948_v21 = vld [vmem:[#allocation8 + $0xb8] sm:$0xff]   ;;  %v950_v23 = vld [vmem:[#allocation8 + $0x20] sm:$0xff]   ;;  %v952_v25 = vld [vmem:[#allocation8 + $0xb0] sm:$0xff]   ;;  %v92_v51 = vrot.slane %v87_v49, %v91_v48 }
  0x3e   :  { %787 = vmatmul.mubr.msk.bf16.vlgmr.msra.gmra.mxu0 %vm166_vm0, %v74_v7  ;;  %v953_v26 = vld [vmem:[#allocation8 + $0x58] sm:$0xff]   ;;  %v956_v29 = vld [vmem:[#allocation8 + $0xa8] sm:$0xff]   ;;  %v957_v30 = vld [vmem:[#allocation8 + $0x50] sm:$0xff]   ;;  %v96_v52 = vrot.slane %v87_v49, %v95_v50  ;;  %v100_v60 = vrot.slane %v87_v49, %v99_v55  ;;  %v104_v62 = vrot.slane %v87_v49, %v103_v58 }
  0x3f   :  { %224 = vmatpush1.bf16.msra.mxu0 %v933_v8  ;;  %243 = vmatprep.mubr.bf16.mxu0 %v1111_v0  ;;  %v954_v27 = vld [vmem:[#allocation8 + $0x18] sm:$0xff]   ;;  %v958_v31 = vld [vmem:[#allocation8 + $0x10] sm:$0xff]   ;;  %v959_v32 = vld [vmem:[#allocation8 + $0xe0] sm:$0xff]  }
  0x40   :  { %225 = vmatprep.subr.bf16.mxu0 %v938_v9  ;;  %837 = vmatpush3.bf16.msra.mxu1 %v944_v14  ;;  %v960_v33 = vld [vmem:[#allocation8 + $0xa0] sm:$0xff]   ;;  %v961_v34 = vld [vmem:[#allocation8 + $0x48] sm:$0xff]   ;;  %v963_v36 = vld [vmem:[#allocation8 + $0xd8] sm:$0xff]  }
  0x41   :  { %838 = vmatprep.subr.bf16.mxu1 %v945_v15  ;;  %v962_v35 = vld [vmem:[#allocation8 + $0x8] sm:$0xff]   ;;  %v964_v37 = vld [vmem:[#allocation8 + $0x98] sm:$0xff]   ;;  %v965_v38 = vld [vmem:[#allocation8 + $0x40] sm:$0xff]  }
  0x42   :  { %v966_v39 = vld [vmem:[#allocation8] sm:$0xff]   ;;  %v967_v40 = vld [vmem:[#allocation8 + $0xd0] sm:$0xff]   ;;  %v969_v42 = vld [vmem:[#allocation8 + $0xc8] sm:$0xff]  }
  0x43   :  { %226 = vmatpush1.bf16.msra.mxu0 %v936_v13  ;;  %v968_v41 = vld [vmem:[#allocation8 + $0x90] sm:$0xff]   ;;  %v971_v43 = vld [vmem:[#allocation8 + $0x88] sm:$0xff]   ;;  %v972_v44 = vld [vmem:[#allocation8 + $0xc0] sm:$0xff]   ;;  %v107_v13 = vsub.s32 4, %v90_v47 }
  0x44   :  { %887 = vmatprep.subr.bf16.mxu0 %v1112_v18  ;;  %839 = vmatpush3.bf16.msra.mxu1 %v946_v17  ;;  %v974_v45 = vld [vmem:[#allocation8 + $0x80] sm:$0xff]   ;;  %v970_v10 = vld [vmem:[#allocation8 + $0x138] sm:$0xff]   ;;  %v973_v15 = vld [vmem:[#allocation8 + $0x130] sm:$0xff]  }
  0x45   :  { %840 = vmatprep.subr.bf16.mxu1 %v949_v22  ;;  %v975_v22 = vld [vmem:[#allocation8 + $0x128] sm:$0xff]  }
  0x46   :  { %788 = vmatmul.mubr.msk.bf16.vlgmr.msra.gmra.mxu0 %vm166_vm0, %v74_v7 }
  0x47   :  { %888 = vmatpush3.bf16.msra.mxu0 %v939_v16  ;;  %891 = vmatprep.mubr.msk.bf16.mxu0 %vm1113_vm1, %v1112_v18 }
  0x48   :  { %889 = vmatprep.subr.bf16.mxu0 %v1112_v18  ;;  %841 = vmatpush3.bf16.msra.mxu1 %v950_v23 }
  0x49   :  { %842 = vmatprep.subr.bf16.mxu1 %v953_v26  ;;  %v978_v26 = vld [vmem:[#allocation8 + $0x110] sm:$0xff]  }
  0x4b   :  { %890 = vmatpush3.bf16.msra.mxu0 %v940_v19 }
  0x4c   :  { %856 = vmatprep.subr.bf16.mxu0 %v947_v20  ;;  %843 = vmatpush3.bf16.msra.mxu1 %v954_v27  ;;  %v108_v20 = vrot.slane %v87_v49, %v107_v13  ;;  %v979_v27 = vld [vmem:[#allocation8 + $0x108] sm:$0xff]  }
  0x4d   :  { %844 = vmatprep.subr.bf16.mxu1 %v957_v30 }
  0x4e   :  { %892 = vmatmul.mubr.msk.bf16.vlgmr.msra.gmra.mxu0 %vm166_vm0, %v74_v7 }
  0x4f   :  { %857 = vmatpush3.bf16.msra.mxu0 %v948_v21 }
  0x50   :  { %858 = vmatprep.subr.bf16.mxu0 %v951_v24  ;;  %845 = vmatpush3.bf16.msra.mxu1 %v958_v31  ;;  %v976_v24 = vld [vmem:[#allocation8 + $0x120] sm:$0xff]  }
  0x51   :  { %846 = vmatprep.subr.bf16.mxu1 %v961_v34 }
  0x53   :  { %859 = vmatpush3.bf16.msra.mxu0 %v952_v25  ;;  %v977_v25 = vld [vmem:[#allocation8 + $0x118] sm:$0xff]  }
  0x54   :  { %860 = vmatprep.subr.bf16.mxu0 %v955_v28  ;;  %847 = vmatpush3.bf16.msra.mxu1 %v962_v35 }
  0x55   :  { %848 = vmatprep.subr.bf16.mxu1 %v965_v38 }
  0x57   :  { %861 = vmatpush3.bf16.msra.mxu0 %v956_v29  ;;  %v980_v29 = vld [vmem:[#allocation8 + $0x100] sm:$0xff]  }
  0x58   :  { %862 = vmatprep.subr.bf16.mxu0 %v959_v32  ;;  %849 = vmatpush3.bf16.msra.mxu1 %v966_v39 }
  0x59   :  { %895 = vmatprep.subr.bf16.mxu1 %v1112_v18 }
  0x5b   :  { %863 = vmatpush3.bf16.msra.mxu0 %v960_v33 }
  0x5c   :  { %864 = vmatprep.subr.bf16.mxu0 %v963_v36 }
  0x5f   :  { %865 = vmatpush3.bf16.msra.mxu0 %v964_v37 }
  0x60   :  { %866 = vmatprep.subr.bf16.mxu0 %v967_v40  ;;  %v790_v40 = vld [vmem:[%s1184_s4] ss:$0 sm:$0xff]  ;;  %s766_s4 = sshll.u32 %s1114_s16, 4  ;;  %s767_s4 = int_to_ptr.vmem [resolvable:$true] %s766_s4 }
  0x61   :  { %s1075_s17 = scalar_lea.vmem %s767_s4, 128  ;;  %p1080_p7 = scmp.lt.s32.totalorder %s767_s4, %s767_s4 }
  0x62   :  { %p1076_p6 = scmp.ne.s32.totalorder %s767_s4, %s1075_s17  ;;  %p1081_p8 = scmp.lt.s32.totalorder %s1075_s17, %s1075_s17 }
  0x63   :  { %867 = vmatpush3.bf16.msra.mxu0 %v968_v41 }
  0x64   :  { %868 = vmatprep.subr.bf16.mxu0 %v969_v42  ;;  %p1082_p9 = por %p1081_p8, %p1080_p7 }
  0x66   :  { %p1083_p10 = pnand %p1082_p9, %p1076_p6 }
  0x67   :  { %869 = vmatpush3.bf16.msra.mxu0 %v971_v43 }
  0x68   :  { %870 = vmatprep.subr.bf16.mxu0 %v972_v44 }
  0x6b   :  { %871 = vmatpush3.bf16.msra.mxu0 %v974_v45 }
  0xfe   :  { %v204_v53 = vpop.f32.mrf.mxu0 }
  0xff   :  { %v205_v54 = vadd.f32 %v204_v53, %v92_v51 }
 0x100   :  { %v206_v56 = vpop.f32.mrf.mxu0 }
 0x101   :  { %v207_v57 = vadd.f32 %v206_v56, %v96_v52  ;;  %981 = vtanh.f32 %v205_v54 }
 0x102   :  { %v208_v59 = vpop.f32.mrf.mxu0 }
 0x103   :  { %983 = vtanh.f32 %v207_v57 }
 0x104   :  { %v209_v61 = vpop.f32.mrf.mxu0 }
 0x106   :  { %v245_v63 = vpop.f32.mrf.mxu0 }
 0x107   :  { %v246_v0 = vadd.f32 %v245_v63, %v100_v60 }
 0x108   :  { %v247_v1 = vpop.f32.mrf.mxu0 }
 0x109   :  { %985 = vtanh.f32 %v246_v0  ;;  %v248_v2 = vadd.f32 %v247_v1, %v104_v62 }
 0x10a   :  { %v249_v3 = vpop.f32.mrf.mxu0 }
 0x10b   :  { %987 = vtanh.f32 %v248_v2 }
 0x10c   :  { %v250_v4 = vpop.f32.mrf.mxu0 }
 0x10e   :  { %v286_v5 = vpop.f32.mrf.mxu0  ;;  %v982_v6 = vpop.eup %981 }
 0x10f   :  { %v297_v11 = vpack.c.bf16 %v982_v6, %v982_v6  ;;  %v287_v23 = vadd.f32 %v286_v5, %v108_v20 }
 0x110   :  { %v984_v7 = vpop.eup %983  ;;  %v893_v8 = vpop.f32.mrf.mxu0 }
 0x111   :  { %v298_v9 = vpack.c.bf16 %v984_v7, %v984_v7  ;;  %989 = vtanh.f32 %v287_v23 }
 0x112   :  { %v289_v12 = vpop.f32.mrf.mxu0 }
 0x113   :  { %661 = vmatprep.mubr.bf16.mxu1 %v298_v9 }
 0x114   :  { %662 = vmatmul.mubr.bf16.vlgmr.msra.gmra.mxu1 %v297_v11  ;;  %v894_v14 = vpop.f32.mrf.mxu0 }
 0x115   :  { %896 = vmatpush3.bf16.msra.mxu1 %v970_v10  ;;  %911 = vmatprep.mubr.msk.bf16.mxu1 %vm1113_vm1, %v1112_v18 }
 0x116   :  { %v986_v16 = vpop.eup %985  ;;  %897 = vmatprep.subr.bf16.mxu1 %v1112_v18 }
 0x117   :  { %v299_v19 = vpack.c.bf16 %v986_v16, %v986_v16 }
 0x118   :  { %v988_v17 = vpop.eup %987 }
 0x119   :  { %898 = vmatpush3.bf16.msra.mxu1 %v973_v15  ;;  %v300_v21 = vpack.c.bf16 %v988_v17, %v988_v17 }
 0x11a   :  { %899 = vmatprep.subr.bf16.mxu1 %v1112_v18 }
 0x11b   :  { %701 = vmatprep.mubr.bf16.mxu0 %v300_v21 }
 0x11c   :  { %702 = vmatmul.mubr.bf16.vlgmr.msra.gmra.mxu0 %v299_v19 }
 0x11d   :  { %900 = vmatpush3.bf16.msra.mxu1 %v975_v22 }
 0x11e   :  { %901 = vmatprep.subr.bf16.mxu1 %v1112_v18  ;;  %v990_v28 = vpop.eup %989 }
 0x11f   :  { %v301_v30 = vpack.c.bf16 %v990_v28, %v990_v28 }
 0x121   :  { %902 = vmatpush3.bf16.msra.mxu1 %v976_v24 }
 0x122   :  { %903 = vmatprep.subr.bf16.mxu1 %v1112_v18 }
 0x125   :  { %904 = vmatpush3.bf16.msra.mxu1 %v977_v25 }
 0x126   :  { %905 = vmatprep.subr.bf16.mxu1 %v1112_v18 }
 0x129   :  { %906 = vmatpush3.bf16.msra.mxu1 %v978_v26 }
 0x12a   :  { %907 = vmatprep.subr.bf16.mxu1 %v1112_v18 }
 0x12d   :  { %908 = vmatpush3.bf16.msra.mxu1 %v979_v27 }
 0x12e   :  { %909 = vmatprep.subr.bf16.mxu1 %v1112_v18 }
 0x131   :  { %910 = vmatpush3.bf16.msra.mxu1 %v980_v29 }
 0x134   :  { %912 = vmatmul.mubr.bf16.vlgmr.msra.gmra.mxu1 %v301_v30 }
 0x1d4   :  { %v850_v31 = vpop.f32.mrf.mxu1 }
 0x1d6   :  { %v851_v32 = vpop.f32.mrf.mxu1 }
 0x1d7   :  { %v852_v39 = vadd.f32 %v851_v32, %v850_v31 }
 0x1d8   :  { %v853_v33 = vpop.f32.mrf.mxu1 }
 0x1d9   :  { %v664_v42 = vadd.f32 %v852_v39, %v790_v40 }
 0x1da   :  { %v854_v34 = vpop.f32.mrf.mxu1 }
 0x1dc   :  { %v872_v35 = vpop.f32.mrf.mxu0 }
 0x1de   :  { %v873_v36 = vpop.f32.mrf.mxu0 }
 0x1df   :  { %v874_v41 = vadd.f32 %v873_v36, %v872_v35 }
 0x1e0   :  { %v875_v37 = vpop.f32.mrf.mxu0 }
 0x1e1   :  { %v704_v43 = vadd.f32 %v874_v41, %v664_v42 }
 0x1e2   :  { %v876_v38 = vpop.f32.mrf.mxu0 }
 0x1f4   :  { %v743_v18 = vpop.f32.mrf.mxu1 }
 0x1f5   :  { %v744_v44 = vadd.f32 %v743_v18, %v704_v43 }
 0x1f6   :  { %v913_v45 = vpop.f32.mrf.mxu1 }
 0x1f7   :  { %749 = vmax.xlane.f32.xlu0 %v744_v44 }
 0x1f8   :  { %v746_v46 = vpop.f32.mrf.mxu1 }
 0x1fa   :  { %v914_v47 = vpop.f32.mrf.mxu1 }
 0x280   :  { %v750_v48 = vpop.xlane.xlu0 %749 }
 0x281   :  { %v751_v49 = vsub.f32 %v744_v44, %v750_v48 }
 0x283   :  { %v752_v50 = vmul.f32 1.442695, %v751_v49 }
 0x285   :  { %991 = vpow2.f32 %v752_v50 }
 0x292   :  { %v992_v51 = vpop.eup %991 }
 0x293   :  { %754 = vadd.xlane.f32.xlu0 %v992_v51 }
 0x31c   :  { %v755_v52 = vpop.xlane.xlu0 %754 }
 0x31d   :  { %993 = vlog2.f32 %v755_v52 }
 0x32a   :  { %v994_v53 = vpop.eup %993 }
 0x32b   :  { %v757_v54 = vmul.f32 0.6931472, %v994_v53 }
 0x32d   :  { %v758_v55 = vsub.f32 %v751_v49, %v757_v54 }
 0x32f   :  { %759 = vst [vmem:[#allocation10] sm:$0xff] %v758_v55 }
 0x330   :  { %1086 = shalt.err (!%p1083_p10)
}
 0x331   :  { %769 = dma.vmem_to_hbm [thread:$0]  %s767_s4, 128, %s1185_s5, [#allocation4]  }
 0x332   :  { %1101 = dma.done.wait [#allocation4], 128  }
 0x333   :  { %1102 = vsyncadd [#allocation4], 4294967168 }
 0x334   :  { %773 = vsyncpa [#allocation3], 1 }
 0x335   :  { %774 = vsyncpa [#allocation6], 1 }
 0x336   :  { %775 = vsyncpa [#allocation9], 1 }
 0x337   :  { %776 = vsyncpa [#allocation4], 1 }

</bundles_post_ra>
